<compile_context>
chip_gen: v7x
topology: tpu7x:2x2x1
jax: 0.10.0
libtpu: 0.0.40
codegen_flags: <defaults>
</compile_context>

<pallas_src>
import functools

import jax
import jax.numpy as jnp
from jax.experimental import pallas as pl
from jax.experimental.pallas import tpu as pltpu


OUT_LANES = 128      # width of the lane-dense output slab
LOGP_OFFSET = 64     # lane offset at which log-probs are written


def _round_up(x, m):
    return (x + m - 1) // m * m


def actor_critic_kernel(x_ref, w1_ref, b1_ref, w2_ref, b2_ref, out_ref, *,
                        action_dim):
    # In-kernel bf16 cast of the input tile (free VPU work hidden under the
    # pipeline; avoids a separate un-hidden XLA pass over x in HBM).
    x = x_ref[...].astype(jnp.bfloat16)

    # ---- fused layer 1 (actor | critic): (TB, S) @ (S, 2H) -> (TB, 2H) ----
    h = jnp.tanh(
        jnp.dot(x, w1_ref[...], preferred_element_type=jnp.float32)
        + b1_ref[...])                                       # f32

    # ---- fused layer 2 (+ duplicated actor block): (TB, 2H) @ (2H, 128) ----
    # (MXU utilization is inherently low at K=8/K=64; kernel is overhead- and
    #  writeback-bound, so no MXU-side retiling is attempted.)
    z = (jnp.dot(h.astype(w2_ref.dtype), w2_ref[...],
                 preferred_element_type=jnp.float32)
         + b2_ref[...])                                      # (TB, 128) f32

    # (1, 128) lane masks: compare once per lane, broadcast inside the selects.
    lane = jax.lax.broadcasted_iota(jnp.int32, (1, OUT_LANES), 1)
    actor_mask = lane < action_dim
    logp_mask = (lane >= LOGP_OFFSET) & (lane < LOGP_OFFSET + action_dim)
    lse_mask = lane == action_dim + 1

    # masked, max-subtracted softmax over the first `action_dim` lanes
    logits = jnp.where(actor_mask, z, -jnp.inf)
    m = jnp.max(logits, axis=-1, keepdims=True)
    e = jnp.exp(logits - m)                                  # 0 on masked lanes
    s = jnp.sum(e, axis=-1, keepdims=True)
    probs = e / s                                            # exact: exp(logp) == probs
    lse = m + jnp.log(s)                                     # (TB, 1) logsumexp

    # Disjoint masks -> 3 selects.  Value lane (A) already holds the critic
    # output inside z, so it rides through the first select untouched.
    out = jnp.where(logp_mask, z - lse, z)                   # log-prob lanes (+ value)
    out = jnp.where(actor_mask, probs, out)                  # prob lanes
    out = jnp.where(lse_mask, lse, out)                      # logsumexp lane
    out_ref[...] = out.astype(out_ref.dtype)                 # lane-dense bf16 store


def init_params(key, state_dim, action_dim, n_latent_var):
    """nn.Linear default init: U(-1/sqrt(fan_in), 1/sqrt(fan_in)); weights (in, out)."""
    ks = jax.random.split(key, 8)

    def lin(kw, kb, fan_in, fan_out):
        bound = 1.0 / jnp.sqrt(fan_in)
        w = jax.random.uniform(kw, (fan_in, fan_out), jnp.float32, -bound, bound)
        b = jax.random.uniform(kb, (1, fan_out), jnp.float32, -bound, bound)
        return w, b

    w1a, b1a = lin(ks[0], ks[1], state_dim, n_latent_var)
    w2a, b2a = lin(ks[2], ks[3], n_latent_var, action_dim)
    w1v, b1v = lin(ks[4], ks[5], state_dim, n_latent_var)
    w2v, b2v = lin(ks[6], ks[7], n_latent_var, 1)
    return dict(w1a=w1a, b1a=b1a, w2a=w2a, b2a=b2a,
                w1v=w1v, b1v=b1v, w2v=w2v, b2v=b2v)


def fuse_params(params, action_dim):
    """Pack the four Linear layers into two fused, lane-dense weight matrices."""
    assert action_dim + 2 <= LOGP_OFFSET and LOGP_OFFSET + action_dim <= OUT_LANES
    w1a, b1a = params["w1a"], params["b1a"]
    w2a, b2a = params["w2a"], params["b2a"]
    w1v, b1v = params["w1v"], params["b1v"]
    w2v, b2v = params["w2v"], params["b2v"]
    H = w1a.shape[1]

    w1 = jnp.concatenate([w1a, w1v], axis=1)                         # (S, 2H)
    b1 = jnp.concatenate([b1a, b1v], axis=1)                         # (1, 2H)

    w2 = jnp.zeros((2 * H, OUT_LANES), jnp.float32)
    w2 = w2.at[:H, :action_dim].set(w2a)                             # actor logits
    w2 = w2.at[H:, action_dim].set(w2v[:, 0])                        # critic value
    w2 = w2.at[:H, LOGP_OFFSET:LOGP_OFFSET + action_dim].set(w2a)    # dup -> logp
    b2 = jnp.zeros((1, OUT_LANES), jnp.float32)
    b2 = b2.at[:, :action_dim].set(b2a[0])
    b2 = b2.at[:, action_dim].set(b2v[0, 0])
    b2 = b2.at[:, LOGP_OFFSET:LOGP_OFFSET + action_dim].set(b2a[0])

    # bf16 MXU operands; biases stay f32 (added post-matmul in f32).
    return (w1.astype(jnp.bfloat16), b1.astype(jnp.float32),
            w2.astype(jnp.bfloat16), b2.astype(jnp.float32))


def _choose_tile(batch, block_b):
    """Batch tile: multiple of 16, capped at block_b, and for medium/large
    batches capped at ~half the batch so the grid has >= 2 steps (lets the
    'parallel' axis shard across v7x's two TensorCores)."""
    tb = min(block_b, _round_up(batch, 16))
    if batch > 16:
        tb = min(tb, _round_up(pl.cdiv(batch, 2), 16))
    return tb


@functools.partial(jax.jit, static_argnames=("action_dim", "block_b"))
def actor_critic_forward(x, fused, *, action_dim, block_b=4096):
    """x: (B, state_dim) f32.  Returns the lane-dense (B, 128) bf16 slab:
       lanes [0, A) probs, lane A value, lane A+1 logsumexp, lanes [64, 64+A) logp."""
    w1, b1, w2, b2 = fused
    B, S = x.shape
    tb = _choose_tile(B, block_b)
    b_pad = _round_up(B, tb)
    if b_pad != B:
        x = jnp.pad(x, ((0, b_pad - B), (0, 0)))

    out = pl.pallas_call(
        functools.partial(actor_critic_kernel, action_dim=action_dim),
        out_shape=jax.ShapeDtypeStruct((b_pad, OUT_LANES), jnp.bfloat16),
        grid_spec=pltpu.PrefetchScalarGridSpec(
            num_scalar_prefetch=0,
            grid=(b_pad // tb,),
            in_specs=[
                pl.BlockSpec((tb, S), lambda i: (i, 0)),       # batch-tiled input (f32)
                # Constant-index blocks: block index never changes, so the
                # pipeline skips their re-DMA -> weights stay resident in VMEM.
                pl.BlockSpec(w1.shape, lambda i: (0, 0)),
                pl.BlockSpec(b1.shape, lambda i: (0, 0)),
                pl.BlockSpec(w2.shape, lambda i: (0, 0)),
                pl.BlockSpec(b2.shape, lambda i: (0, 0)),
            ],
            out_specs=pl.BlockSpec((tb, OUT_LANES), lambda i: (i, 0)),
        ),
        compiler_params=pltpu.CompilerParams(
            dimension_semantics=("parallel",)),                # v7x dual-TC sharding
    )(x, w1, b1, w2, b2)
    return out[:B]


@functools.partial(jax.jit, static_argnames=("action_dim",))
def act(key, slab, *, action_dim):
    """ActorCritic.act() glue: Categorical sample / log_prob / entropy / value,
    computed directly from the kernel slab in ONE fused XLA pass (no per-field
    HBM re-slicing passes)."""
    slab = slab.astype(jnp.float32)
    probs = slab[:, :action_dim]
    value = slab[:, action_dim]
    logp = slab[:, LOGP_OFFSET:LOGP_OFFSET + action_dim]
    action = jax.random.categorical(key, logp, axis=-1)          # dist.sample()
    action_logprob = jnp.take_along_axis(logp, action[:, None], axis=-1)[:, 0]
    entropy = -jnp.sum(probs * logp, axis=-1)                    # dist.entropy()
    return action, action_logprob, entropy, value
    # TODO(synk): Memory.append(...) bookkeeping and action.item() are host-side
    # glue in the PyTorch module and remain outside the kernel.


if __name__ == "__main__":
    state_dim, action_dim, n_latent_var = 8, 4, 32
    batch = 2

    key = jax.random.PRNGKey(0)
    k_param, k_state, k_sample = jax.random.split(key, 3)

    params = init_params(k_param, state_dim, action_dim, n_latent_var)
    fused = fuse_params(params, action_dim)
    state = jax.random.normal(k_state, (batch, state_dim), jnp.float32)

    slab = actor_critic_forward(state, fused, action_dim=action_dim)
    jax.block_until_ready(slab)

    # Slice the slab once (test only) and compare against a plain f32 reference
    # (same math as the PyTorch module); tolerances cover bf16 operands/output.
    slab_f32 = jnp.asarray(slab, jnp.float32)
    probs = slab_f32[:, :action_dim]
    value = slab_f32[:, action_dim:action_dim + 1]
    lse = slab_f32[:, action_dim + 1:action_dim + 2]
    logp = slab_f32[:, LOGP_OFFSET:LOGP_OFFSET + action_dim]

    h_a = jnp.tanh(state @ params["w1a"] + params["b1a"])
    ref_logits = h_a @ params["w2a"] + params["b2a"]
    ref_probs = jax.nn.softmax(ref_logits, axis=-1)
    ref_logp = jax.nn.log_softmax(ref_logits, axis=-1)
    ref_lse = jax.scipy.special.logsumexp(ref_logits, axis=-1, keepdims=True)
    h_v = jnp.tanh(state @ params["w1v"] + params["b1v"])
    ref_value = h_v @ params["w2v"] + params["b2v"]

    assert jnp.allclose(probs, ref_probs, atol=5e-2, rtol=5e-2)
    assert jnp.allclose(value, ref_value, atol=5e-2, rtol=5e-2)
    assert jnp.allclose(logp, ref_logp, atol=5e-2, rtol=5e-2)
    assert jnp.allclose(lse, ref_lse, atol=5e-2, rtol=5e-2)
    assert jnp.allclose(jnp.sum(probs, axis=-1), 1.0, atol=1e-2)

    # act(): sample / log_prob / entropy / value straight from the slab.
    action, action_logprob, entropy, val = act(k_sample, slab,
                                               action_dim=action_dim)
    jax.block_until_ready((action, action_logprob, entropy, val))
    assert action.shape == (batch,)
    assert jnp.all(entropy >= 0.0)

    print("KERNEL_OK")
</pallas_src>

<mosaic_0001>
module attributes {stable_mosaic.version = 11 : i64} {
  func.func @actor_critic_kernel(%arg0: i32, %arg1: memref<16x8xf32, #tpu.memory_space<vmem>>, %arg2: memref<8x64xbf16, #tpu.memory_space<vmem>>, %arg3: memref<1x64xf32, #tpu.memory_space<vmem>>, %arg4: memref<64x128xbf16, #tpu.memory_space<vmem>>, %arg5: memref<1x128xf32, #tpu.memory_space<vmem>>, %arg6: memref<16x128xbf16, #tpu.memory_space<vmem>>) attributes {dimension_semantics = [#tpu.dimension_semantics<parallel>], iteration_bounds = array<i64: 1>, scalar_prefetch = 0 : i64, scratch_operands = 0 : i64, tpu.core_type = #tpu.core_type<tc>, window_params = [{transform_indices = @transform_0, window_bounds = array<i64: 16, 8>}, {pipeline_mode = #tpu.pipeline_mode<synchronous>, transform_indices = @transform_1, window_bounds = array<i64: 8, 64>}, {pipeline_mode = #tpu.pipeline_mode<synchronous>, transform_indices = @transform_2, window_bounds = array<i64: 1, 64>}, {pipeline_mode = #tpu.pipeline_mode<synchronous>, transform_indices = @transform_3, window_bounds = array<i64: 64, 128>}, {pipeline_mode = #tpu.pipeline_mode<synchronous>, transform_indices = @transform_4, window_bounds = array<i64: 1, 128>}, {transform_indices = @transform_5, window_bounds = array<i64: 16, 128>}]} {
    %c0 = arith.constant 0 : index
    %c0_0 = arith.constant 0 : index
    %0 = vector.load %arg1[%c0, %c0_0] : memref<16x8xf32, #tpu.memory_space<vmem>>, vector<16x8xf32>
    %1 = arith.truncf %0 : vector<16x8xf32> to vector<16x8xbf16>
    %c0_1 = arith.constant 0 : index
    %c0_2 = arith.constant 0 : index
    %2 = vector.load %arg2[%c0_1, %c0_2] : memref<8x64xbf16, #tpu.memory_space<vmem>>, vector<8x64xbf16>
    %cst = arith.constant dense<0.000000e+00> : vector<16x64xf32>
    %3 = tpu.matmul %1, %2, %cst {dimension_numbers = #tpu.dot_dimension_numbers<[1], [0], [0], [1], [0, 0, 1, 1], [], []>} : vector<16x8xbf16>, vector<8x64xbf16>, vector<16x64xf32> -> vector<16x64xf32>
    %c0_3 = arith.constant 0 : index
    %c0_4 = arith.constant 0 : index
    %4 = vector.load %arg3[%c0_3, %c0_4] : memref<1x64xf32, #tpu.memory_space<vmem>>, vector<1x64xf32>
    %5 = vector.broadcast %4 : vector<1x64xf32> to vector<16x64xf32>
    %6 = arith.addf %3, %5 : vector<16x64xf32>
    %7 = math.tanh %6 : vector<16x64xf32>
    %8 = arith.truncf %7 : vector<16x64xf32> to vector<16x64xbf16>
    %c0_5 = arith.constant 0 : index
    %c0_6 = arith.constant 0 : index
    %9 = vector.load %arg4[%c0_5, %c0_6] : memref<64x128xbf16, #tpu.memory_space<vmem>>, vector<64x128xbf16>
    %cst_7 = arith.constant dense<0.000000e+00> : vector<16x128xf32>
    %10 = tpu.matmul %8, %9, %cst_7 {dimension_numbers = #tpu.dot_dimension_numbers<[1], [0], [0], [1], [0, 0, 1, 1], [], []>} : vector<16x64xbf16>, vector<64x128xbf16>, vector<16x128xf32> -> vector<16x128xf32>
    %c0_8 = arith.constant 0 : index
    %c0_9 = arith.constant 0 : index
    %11 = vector.load %arg5[%c0_8, %c0_9] : memref<1x128xf32, #tpu.memory_space<vmem>>, vector<1x128xf32>
    %12 = vector.broadcast %11 : vector<1x128xf32> to vector<16x128xf32>
    %13 = arith.addf %10, %12 : vector<16x128xf32>
    %14 = tpu.iota {dimensions = array<i32: 1>} : vector<1x128xi32>
    %c4_i32 = arith.constant 4 : i32
    %15 = vector.broadcast %c4_i32 : i32 to vector<1x128xi32>
    %16 = arith.cmpi slt, %14, %15 : vector<1x128xi32>
    %c64_i32 = arith.constant 64 : i32
    %17 = vector.broadcast %c64_i32 : i32 to vector<1x128xi32>
    %18 = arith.cmpi sge, %14, %17 : vector<1x128xi32>
    %c68_i32 = arith.constant 68 : i32
    %19 = vector.broadcast %c68_i32 : i32 to vector<1x128xi32>
    %20 = arith.cmpi slt, %14, %19 : vector<1x128xi32>
    %21 = arith.andi %18, %20 : vector<1x128xi1>
    %c5_i32 = arith.constant 5 : i32
    %22 = vector.broadcast %c5_i32 : i32 to vector<1x128xi32>
    %23 = arith.cmpi eq, %14, %22 : vector<1x128xi32>
    %cst_10 = arith.constant 0xFF800000 : f32
    %24 = vector.shape_cast %16 : vector<1x128xi1> to vector<1x128xi1>
    %25 = vector.broadcast %24 : vector<1x128xi1> to vector<16x128xi1>
    %26 = vector.broadcast %cst_10 : f32 to vector<16x128xf32>
    %27 = arith.select %25, %13, %26 : vector<16x128xi1>, vector<16x128xf32>
    %cst_11 = arith.constant dense<0xFF800000> : vector<16xf32>
    %28 = vector.multi_reduction <maximumf>, %27, %cst_11 [1] : vector<16x128xf32> to vector<16xf32>
    %29 = vector.shape_cast %28 : vector<16xf32> to vector<16x1xf32>
    %30 = vector.broadcast %29 : vector<16x1xf32> to vector<16x128xf32>
    %31 = arith.subf %27, %30 : vector<16x128xf32>
    %32 = math.exp %31 : vector<16x128xf32>
    %cst_12 = arith.constant dense<0.000000e+00> : vector<16xf32>
    %33 = vector.multi_reduction <add>, %32, %cst_12 [1] : vector<16x128xf32> to vector<16xf32>
    %34 = vector.shape_cast %33 : vector<16xf32> to vector<16x1xf32>
    %35 = vector.broadcast %34 : vector<16x1xf32> to vector<16x128xf32>
    %36 = arith.divf %32, %35 : vector<16x128xf32>
    %37 = math.log %34 : vector<16x1xf32>
    %38 = arith.addf %29, %37 : vector<16x1xf32>
    %39 = vector.broadcast %38 : vector<16x1xf32> to vector<16x128xf32>
    %40 = arith.subf %13, %39 : vector<16x128xf32>
    %41 = vector.shape_cast %21 : vector<1x128xi1> to vector<1x128xi1>
    %42 = vector.broadcast %41 : vector<1x128xi1> to vector<16x128xi1>
    %43 = arith.select %42, %40, %13 : vector<16x128xi1>, vector<16x128xf32>
    %44 = vector.shape_cast %16 : vector<1x128xi1> to vector<1x128xi1>
    %45 = vector.broadcast %44 : vector<1x128xi1> to vector<16x128xi1>
    %46 = arith.select %45, %36, %43 : vector<16x128xi1>, vector<16x128xf32>
    %47 = vector.shape_cast %23 : vector<1x128xi1> to vector<1x128xi1>
    %48 = vector.broadcast %47 : vector<1x128xi1> to vector<16x128xi1>
    %49 = vector.shape_cast %38 : vector<16x1xf32> to vector<16x1xf32>
    %50 = vector.broadcast %49 : vector<16x1xf32> to vector<16x128xf32>
    %51 = arith.select %48, %50, %46 : vector<16x128xi1>, vector<16x128xf32>
    %52 = arith.truncf %51 : vector<16x128xf32> to vector<16x128xbf16>
    %c0_13 = arith.constant 0 : index
    %c0_14 = arith.constant 0 : index
    %53 = vector.load %arg6[%c0_13, %c0_14] : memref<16x128xbf16, #tpu.memory_space<vmem>>, vector<16x128xbf16>
    tpu.vector_store %arg6[%c0_13, %c0_14], %52 {strides = array<i32>} : memref<16x128xbf16, #tpu.memory_space<vmem>>, vector<16x128xbf16>,
    return
  }
  func.func @transform_0(%arg0: i32) -> (i32, i32) {
    %c0_i32 = arith.constant 0 : i32
    %c0_i32_0 = arith.constant 0 : i32
    return %arg0, %c0_i32 : i32, i32
  }
  func.func @transform_1(%arg0: i32) -> (i32, i32) {
    %c0_i32 = arith.constant 0 : i32
    %c0_i32_0 = arith.constant 0 : i32
    %c0_i32_1 = arith.constant 0 : i32
    return %c0_i32, %c0_i32_0 : i32, i32
  }
  func.func @transform_2(%arg0: i32) -> (i32, i32) {
    %c0_i32 = arith.constant 0 : i32
    %c0_i32_0 = arith.constant 0 : i32
    %c0_i32_1 = arith.constant 0 : i32
    return %c0_i32, %c0_i32_0 : i32, i32
  }
  func.func @transform_3(%arg0: i32) -> (i32, i32) {
    %c0_i32 = arith.constant 0 : i32
    %c0_i32_0 = arith.constant 0 : i32
    %c0_i32_1 = arith.constant 0 : i32
    return %c0_i32, %c0_i32_0 : i32, i32
  }
  func.func @transform_4(%arg0: i32) -> (i32, i32) {
    %c0_i32 = arith.constant 0 : i32
    %c0_i32_0 = arith.constant 0 : i32
    %c0_i32_1 = arith.constant 0 : i32
    return %c0_i32, %c0_i32_0 : i32, i32
  }
  func.func @transform_5(%arg0: i32) -> (i32, i32) {
    %c0_i32 = arith.constant 0 : i32
    %c0_i32_0 = arith.constant 0 : i32
    return %arg0, %c0_i32 : i32, i32
  }
}

</mosaic_0001>

<bundles_post_ra>
// kernel: actor_critic_forward.1
= control target key start
LH: loop header
LB: loop body
LE: loop exit
PB: predicated region body
PF: predicated region fallthrough
CT: control target
= control target key end

     0   :  { %10 = vsyncpa [#allocation3], 0  ;;  %s335_s18 = smov [#allocation2]   ;;  %s404_s0 = inlined_call_operand.vmem [shape: f32[16,8], index: 0, kind: input, shape index: {}]   ;;  %s405_s1 = inlined_call_operand.vmem [shape: bf16[8,64], index: 1, kind: input, shape index: {}]   ;;  %s406_s2 = inlined_call_operand.vmem [shape: f32[1,64], index: 2, kind: input, shape index: {}]   ;;  %s407_s3 = inlined_call_operand.hbm [shape: bf16[64,128], index: 3, kind: input, shape index: {}]   ;;  %s408_s4 = inlined_call_operand.vmem [shape: f32[1,128], index: 4, kind: input, shape index: {}]   ;;  %s409_s5 = inlined_call_operand.vmem [shape: bf16[16,128], index: 5, kind: output, shape index: {}]  }
   0x1   :  { %s22_s19 = sshll.u32 %s335_s18, 4  ;;  %s311_s22 = scalar_lea.hbm %s407_s3, 512  ;;  %s23_s19 = int_to_ptr.vmem [resolvable:$true] %s22_s19 }
   0x2   :  { %p312_p0 = scmp.ne.s32.totalorder %s407_s3, %s311_s22  ;;  %p315_p1 = scmp.lt.u32.totalorder %s311_s22, %s407_s3 }
   0x4   :  { %p317_p2 = pnand %p315_p1, %p312_p0 }
   0x6   :  { %320 = shalt.err (!%p317_p2)
}
   0x7   :  { %s321_s27 = scalar_lea.vmem %s23_s19, 512  ;;  %p326_p4 = scmp.lt.s32.totalorder %s23_s19, %s23_s19 }
   0x8   :  { %p322_p3 = scmp.ne.s32.totalorder %s23_s19, %s321_s27  ;;  %p327_p5 = scmp.lt.s32.totalorder %s321_s27, %s321_s27 }
   0xa   :  { %p328_p6 = por %p327_p5, %p326_p4 }
   0xc   :  { %p329_p7 = pnand %p328_p6, %p322_p3 }
   0xe   :  { %332 = shalt.err (!%p329_p7)
}
   0xf   :  { %s336_s28 = smov 64   ;;  %s337_s29 = smov 4  }
  0x10   :  { %28 = dma.hbm_to_vmem [thread:$0]  %s407_s3, 512, %s23_s19, [#allocation3], %s336_s28, %s336_s28, %s337_s29  }
  0x11   :  { %333 = dma.done.wait [#allocation3], 512  }
  0x12   :  { %334 = vsyncadd [#allocation3], 4294966784  ;;  %v338_v0 = vmov 0.0   ;;  %vm339_vm0 = vmmov 0   ;;  %vm50_vm1 = vcmask 1043456   ;;  %v35_v2 = vld [vmem:[%s404_s0] sm:$0xff]  ;;  %v182_v20 = vlaneseq }
  0x13   :  { %268 = vmatprep.subr.bf16.mxu0 %v338_v0  ;;  %270 = vmatprep.mubr.msk.bf16.mxu0 %vm339_vm0, %v338_v0  ;;  %v38_v1 = vld [vmem:[%s405_s1] sm:$0xf]  ;;  %v36_v3 = vld [vmem:[%s404_s0 + $0x8] sm:$0xff]  ;;  %vm46_vm2 = vcmask 64512   ;;  %v293_v8 = vld [vmem:[#allocation2 + $0x10] sm:$0xff]   ;;  %vm137_vm3 = vcmask 523264  }
  0x14   :  { %274 = vmatprep.subr.bf16.mxu1 %v338_v0  ;;  %282 = vmatprep.mubr.msk.bf16.mxu1 %vm339_vm0, %v338_v0  ;;  %v52_v4 = vsel %vm50_vm1, %v38_v1, 0  ;;  %v37_v5 = vpack.c.bf16 %v36_v3, %v35_v2  ;;  %v291_v6 = vld [vmem:[#allocation2] sm:$0xff]   ;;  %v292_v7 = vld [vmem:[#allocation2 + $0x8] sm:$0xff]   ;;  %v294_v9 = vld [vmem:[#allocation2 + $0x18] sm:$0xff]   ;;  %v183_v21 = vand.u32 127, %v182_v20 }
  0x15   :  { %269 = vmatpush3.bf16.msra.mxu0 %v52_v4  ;;  %275 = vmatpush3.bf16.msra.mxu1 %v291_v6  ;;  %v244_v10 = vld [vmem:[%s406_s2] ss:$0 sm:$0xff] }
  0x16   :  { %276 = vmatprep.subr.bf16.mxu1 %v338_v0  ;;  %v246_v22 = vld [vmem:[%s408_s4] ss:$0 sm:$0xff]  ;;  %vm184_vm4 = vcmp.lt.s32.totalorder %v183_v21, 4  ;;  %vm185_vm5 = vcmp.ge.s32.totalorder %v183_v21, 64  ;;  %vm186_vm6 = vcmp.lt.s32.totalorder %v183_v21, 68  ;;  %vm188_vm8 = vcmp.eq.s32.totalorder %v183_v21, 5 }
  0x17   :  { %vm187_vm7 = vmand %vm185_vm5, %vm186_vm6 }
  0x18   :  { %271 = vmatmul.mubr.msk.bf16.vlgmr.msra.gmra.mrb[0].mxu0 %vm46_vm2, %v37_v5 }
  0x19   :  { %277 = vmatpush3.bf16.msra.mxu1 %v292_v7 }
  0x1a   :  { %278 = vmatprep.subr.bf16.mxu1 %v338_v0 }
  0x1d   :  { %279 = vmatpush3.bf16.msra.mxu1 %v293_v8 }
  0x1e   :  { %280 = vmatprep.subr.bf16.mxu1 %v338_v0 }
  0x21   :  { %281 = vmatpush3.bf16.msra.mxu1 %v294_v9 }
  0xeb   :  { %v88_v11 = vpop.f32.mrb[0].mxu0 }
  0xec   :  { %v89_v12 = vadd.f32 %v244_v10, %v88_v11  ;;  %v272_v13 = vpop.f32.mrb[1].mxu0 }
  0xed   :  { %v91_v14 = vpop.f32.mrb[2].mxu0 }
  0xee   :  { %v92_v15 = vadd.f32 %v244_v10, %v91_v14  ;;  %v273_v16 = vpop.f32.mrb[3].mxu0  ;;  %295 = vtanh.f32 %v89_v12 }
  0xf0   :  { %297 = vtanh.f32 %v92_v15 }
  0xf8   :  { %v296_v17 = vpop.eup %295 }
  0xfa   :  { %v298_v18 = vpop.eup %297 }
  0xfb   :  { %v97_v19 = vpack.c.bf16 %v298_v18, %v296_v17 }
  0xfd   :  { %283 = vmatmul.mubr.msk.bf16.vlgmr.msra.gmra.mrb[0].mxu1 %vm137_vm3, %v97_v19 }
 0x1d0   :  { %v175_v23 = vpop.f32.mrb[0].mxu1 }
 0x1d1   :  { %v176_v24 = vadd.f32 %v246_v22, %v175_v23  ;;  %v284_v25 = vpop.f32.mrb[1].mxu1 }
 0x1d2   :  { %v178_v26 = vpop.f32.mrb[2].mxu1 }
 0x1d3   :  { %v179_v27 = vadd.f32 %v246_v22, %v178_v26  ;;  %v285_v28 = vpop.f32.mrb[3].mxu1  ;;  %v191_v29 = vsel %vm184_vm4, %v176_v24, -inf }
 0x1d4   :  { %193 = vmax.xlane.f32.xlu0 %v191_v29 }
 0x1d5   :  { %v192_v30 = vsel %vm184_vm4, %v179_v27, -inf }
 0x1d8   :  { %195 = vmax.xlane.f32.xlu0 %v192_v30 }
 0x261   :  { %v194_v31 = vpop.xlane.xlu0 %193 }
 0x262   :  { %v197_v32 = vsub.f32 %v191_v29, %v194_v31 }
 0x264   :  { %v199_v33 = vmul.f32 1.442695, %v197_v32 }
 0x265   :  { %v196_v34 = vpop.xlane.xlu0 %195 }
 0x266   :  { %299 = vpow2.f32 %v199_v33  ;;  %v198_v35 = vsub.f32 %v192_v30, %v196_v34 }
 0x268   :  { %v201_v36 = vmul.f32 1.442695, %v198_v35 }
 0x26a   :  { %301 = vpow2.f32 %v201_v36 }
 0x270   :  { %v300_v37 = vpop.eup %299 }
 0x271   :  { %203 = vadd.xlane.f32.xlu1 %v300_v37 }
 0x274   :  { %v302_v38 = vpop.eup %301 }
 0x275   :  { %205 = vadd.xlane.f32.xlu1 %v302_v38 }
 0x2fe   :  { %v204_v39 = vpop.xlane.xlu1 %203 }
 0x2ff   :  { %303 = vlog2.f32 %v204_v39 }
 0x302   :  { %v206_v40 = vpop.xlane.xlu1 %205 }
 0x303   :  { %305 = vlog2.f32 %v206_v40 }
 0x304   :  { %307 = vrcp.f32 %v204_v39 }
 0x305   :  { %309 = vrcp.f32 %v206_v40 }
 0x309   :  { %v304_v41 = vpop.eup %303 }
 0x30a   :  { %v212_v42 = vmul.f32 0.6931472, %v304_v41 }
 0x30c   :  { %v215_v43 = vadd.f32 %v212_v42, %v194_v31 }
 0x30d   :  { %v306_v44 = vpop.eup %305 }
 0x30e   :  { %v308_v45 = vpop.eup %307  ;;  %v217_v46 = vsub.f32 %v176_v24, %v215_v43  ;;  %v214_v47 = vmul.f32 0.6931472, %v306_v44 }
 0x30f   :  { %v310_v48 = vpop.eup %309  ;;  %v208_v51 = vmul.f32 %v308_v45, %v300_v37 }
 0x310   :  { %v221_v49 = vsel %vm187_vm7, %v217_v46, %v176_v24  ;;  %v216_v50 = vadd.f32 %v214_v47, %v196_v34  ;;  %v210_v54 = vmul.f32 %v310_v48, %v302_v38 }
 0x311   :  { %v223_v53 = vsel %vm184_vm4, %v208_v51, %v221_v49 }
 0x312   :  { %v218_v52 = vsub.f32 %v179_v27, %v216_v50  ;;  %v227_v57 = vsel %vm188_vm8, %v215_v43, %v223_v53 }
 0x314   :  { %v222_v55 = vsel %vm187_vm7, %v218_v52, %v179_v27 }
 0x315   :  { %v224_v56 = vsel %vm184_vm4, %v210_v54, %v222_v55 }
 0x316   :  { %v228_v58 = vsel %vm188_vm8, %v216_v50, %v224_v56 }
 0x317   :  { %v259_v59 = vpack.c.bf16 %v228_v58, %v227_v57 }
 0x319   :  { %260 = vst [vmem:[%s409_s5] sm:$0xff] %v259_v59  }
 0x31a   :  { %243 = vsyncpa [#allocation3], 1 }

</bundles_post_ra>
